<compile_context>
chip_gen: v5e
topology: v5e:2x2
jax: 0.10.0
libtpu: 0.0.40
codegen_flags: <defaults>
</compile_context>

<pallas_src>
import jax
import jax.numpy as jnp
from jax.experimental import pallas as pl
from jax.experimental.pallas import tpu as pltpu

KERNEL_SIZE = 25
PAD = KERNEL_SIZE // 2
SUBLANE = 8


def _round_up(n, m):
    return ((n + m - 1) // m) * m


def _ld_kernel(bias_ref, a_ref, x_ref, o_ref):
    """One MXU matmul per (batch, L-tile):  o = A_tile @ x_b + bias.

    bias_ref : SMEM (1,)        Conv1d bias (0.0 in the module)
    a_ref    : VMEM (tl, L)     row tile of the padding-folded smoothing matrix
    x_ref    : VMEM (L, C)      one batch of the input, native layout
    o_ref    : VMEM (tl, C)     smoothed output rows
    """
    acc = jnp.dot(a_ref[...], x_ref[...], preferred_element_type=jnp.float32)
    o_ref[...] = (acc + bias_ref[0]).astype(o_ref.dtype)


def make_params(seq_len):
    """Gaussian-softmax taps, zero bias, and the padding-folded (L, L) matrix.

    A[l, r] = sum_k taps[k] * [clip(l + k - PAD, 0, L-1) == r], so that
    (A @ x)[l, c] reproduces the replicate-padded cross-correlation exactly.
    Built once here, never per forward call.
    """
    i = jnp.arange(KERNEL_SIZE, dtype=jnp.float32)
    taps = jax.nn.softmax(jnp.exp(-(((i - PAD) / 2.0) ** 2)), axis=-1)
    bias = jnp.zeros((1,), jnp.float32)  # Conv1d bias, filled with 0.0

    l_idx = jnp.arange(seq_len, dtype=jnp.int32)[:, None]        # (L, 1)
    k_idx = jnp.arange(KERNEL_SIZE, dtype=jnp.int32)[None, :]    # (1, K)
    src = jnp.clip(l_idx + k_idx - PAD, 0, seq_len - 1)          # (L, K)
    a_mat = (
        jnp.zeros((seq_len, seq_len), jnp.float32)
        .at[jnp.broadcast_to(l_idx, src.shape), src]
        .add(jnp.broadcast_to(taps[None, :], src.shape))         # dup idx accumulate
    )
    return taps, bias, a_mat


def model_forward(x, a_mat, conv_bias, *, tile_l=512):
    """x: (B, L, C) float32 -> (B, L, C) float32 (LD.forward)."""
    B, L, C = x.shape
    assert a_mat.shape == (L, L)

    # Tile the output time axis; pad only the (static) weight rows, never x.
    tl = min(tile_l, _round_up(L, SUBLANE))
    lp = _round_up(L, tl)
    a = a_mat if lp == L else jnp.pad(a_mat, ((0, lp - L), (0, 0)))

    out = pl.pallas_call(
        _ld_kernel,
        out_shape=jax.ShapeDtypeStruct((B, lp, C), jnp.float32),
        grid=(B, lp // tl),
        in_specs=[
            pl.BlockSpec(memory_space=pltpu.MemorySpace.SMEM),    # conv bias scalar
            pl.BlockSpec((tl, L), lambda b, i: (i, 0)),           # smoothing rows
            pl.BlockSpec((None, L, C), lambda b, i: (b, 0, 0)),   # x[b], batch squeezed
        ],
        out_specs=pl.BlockSpec((None, tl, C), lambda b, i: (b, i, 0)),
        compiler_params=pltpu.CompilerParams(
            dimension_semantics=("parallel", "parallel"),  # shard across TCs (v7x)
            vmem_limit_bytes=48 * 1024 * 1024,             # per-step use is KB..few MB
        ),
    )(conv_bias, a, x)

    return out if lp == L else out[:, :L, :]


def reference_forward(x, taps, conv_bias):
    """Pure-JAX reference mirroring LD.forward (tap-by-tap, no matmul)."""
    B, L, C = x.shape
    xr = jnp.transpose(x, (0, 2, 1))                              # (B, C, L)
    xpad = jnp.pad(xr, ((0, 0), (0, 0), (PAD, PAD)), mode="edge")
    out = sum(taps[k] * xpad[:, :, k:k + L] for k in range(KERNEL_SIZE))
    out = out + conv_bias[0]
    return jnp.transpose(out, (0, 2, 1))                          # (B, L, C)


if __name__ == "__main__":
    B, SEQ_LEN, ENC_IN = 2, 16, 4

    key = jax.random.PRNGKey(0)
    x = jax.random.normal(key, (B, SEQ_LEN, ENC_IN), jnp.float32)
    taps, conv_bias, a_mat = make_params(SEQ_LEN)

    out = model_forward(x, a_mat, conv_bias)
    out = jax.block_until_ready(out)

    ref = reference_forward(x, taps, conv_bias)
    assert out.shape == (B, SEQ_LEN, ENC_IN)
    # f32 MXU matmul (multi-pass) over a length-16 contraction: error ~1e-5;
    # structural bugs (padding/band/layout) would be O(1).
    assert jnp.allclose(out, ref, atol=1e-3, rtol=1e-3), "mismatch vs reference"

    print("KERNEL_OK")
</pallas_src>

<mosaic_0001>
module attributes {stable_mosaic.version = 11 : i64} {
  func.func @_ld_kernel(%arg0: i32, %arg1: i32, %arg2: memref<1xf32, #tpu.memory_space<smem>>, %arg3: memref<16x16xf32, #tpu.memory_space<vmem>>, %arg4: memref<1x16x4xf32, #tpu.memory_space<vmem>>, %arg5: memref<1x16x4xf32, #tpu.memory_space<vmem>>) attributes {dimension_semantics = [#tpu.dimension_semantics<parallel>, #tpu.dimension_semantics<parallel>], iteration_bounds = array<i64: 2, 1>, scalar_prefetch = 0 : i64, scratch_operands = 0 : i64, tpu.core_type = #tpu.core_type<tc>, window_params = [{transform_indices = @transform_0, window_bounds = array<i64: 1>}, {transform_indices = @transform_1, window_bounds = array<i64: 16, 16>}, {transform_indices = @transform_2, window_bounds = array<i64: 1, 16, 4>}, {transform_indices = @transform_3, window_bounds = array<i64: 1, 16, 4>}]} {
    %c0 = arith.constant 0 : index
    %c0_0 = arith.constant 0 : index
    %0 = vector.load %arg3[%c0, %c0_0] : memref<16x16xf32, #tpu.memory_space<vmem>>, vector<16x16xf32>
    %c0_1 = arith.constant 0 : index
    %c0_2 = arith.constant 0 : index
    %c0_3 = arith.constant 0 : index
    %1 = vector.load %arg4[%c0_1, %c0_2, %c0_3] : memref<1x16x4xf32, #tpu.memory_space<vmem>>, vector<1x16x4xf32>
    %2 = vector.shape_cast %1 : vector<1x16x4xf32> to vector<16x4xf32>
    %cst = arith.constant dense<0.000000e+00> : vector<16x4xf32>
    %3 = tpu.matmul %0, %2, %cst {dimension_numbers = #tpu.dot_dimension_numbers<[1], [0], [0], [1], [0, 0, 1, 1], [], []>} : vector<16x16xf32>, vector<16x4xf32>, vector<16x4xf32> -> vector<16x4xf32>
    %c0_4 = arith.constant 0 : index
    %4 = memref.load %arg2[%c0_4] : memref<1xf32, #tpu.memory_space<smem>>
    %5 = vector.broadcast %4 : f32 to vector<16x4xf32>
    %6 = arith.addf %3, %5 : vector<16x4xf32>
    %c0_5 = arith.constant 0 : index
    %c0_6 = arith.constant 0 : index
    %c0_7 = arith.constant 0 : index
    %7 = vector.load %arg5[%c0_5, %c0_6, %c0_7] : memref<1x16x4xf32, #tpu.memory_space<vmem>>, vector<1x16x4xf32>
    %8 = vector.shape_cast %7 : vector<1x16x4xf32> to vector<16x4xf32>
    %9 = vector.shape_cast %6 : vector<16x4xf32> to vector<1x16x4xf32>
    tpu.vector_store %arg5[%c0_5, %c0_6, %c0_7], %9 {strides = array<i32>} : memref<1x16x4xf32, #tpu.memory_space<vmem>>, vector<1x16x4xf32>,
    return
  }
  func.func @transform_0(%arg0: i32, %arg1: i32) -> i32 {
    %c0_i32 = arith.constant 0 : i32
    %c0_i32_0 = arith.constant 0 : i32
    return %c0_i32 : i32
  }
  func.func @transform_1(%arg0: i32, %arg1: i32) -> (i32, i32) {
    %c0_i32 = arith.constant 0 : i32
    %c0_i32_0 = arith.constant 0 : i32
    return %arg1, %c0_i32 : i32, i32
  }
  func.func @transform_2(%arg0: i32, %arg1: i32) -> (i32, i32, i32) {
    %c0_i32 = arith.constant 0 : i32
    %c0_i32_0 = arith.constant 0 : i32
    %c0_i32_1 = arith.constant 0 : i32
    return %arg0, %c0_i32, %c0_i32_0 : i32, i32, i32
  }
  func.func @transform_3(%arg0: i32, %arg1: i32) -> (i32, i32, i32) {
    %c0_i32 = arith.constant 0 : i32
    %c0_i32_0 = arith.constant 0 : i32
    return %arg0, %arg1, %c0_i32 : i32, i32, i32
  }
}

</mosaic_0001>

<bundles_post_ra>
// kernel: tpu_custom_call.1
= control target key start
LH: loop header
LB: loop body
LE: loop exit
PB: predicated region body
PF: predicated region fallthrough
CT: control target
= control target key end

     0   :  { %s441_s14 = smov 0   ;;  %s443_s15 = smov 0   ;;  %s480_s0 = inlined_call_operand.<no memory space> [shape: f32[1], index: 0, kind: input, shape index: {}]   ;;  %s481_s1 = inlined_call_operand.vmem [shape: f32[16,16], index: 1, kind: input, shape index: {}]   ;;  %s482_s2 = inlined_call_operand.vmem [shape: f32[2,16,4], index: 2, kind: input, shape index: {}]   ;;  %s483_s3 = inlined_call_operand.vmem [shape: f32[2,16,4], index: 3, kind: output, shape index: {}]  }
   0x1   :  { %8 = sst [smem:[#allocation2]] %s480_s0  ;;  %s445_s16 = smov 0  }
   0x2 LB: > { %s26_s0 = sadd.s32 1, %s412_s15  ;;  %p357_p0 = scmp.ge.s32.totalorder %s416_s16, 1  ;;  %s416_s16 = sphi %s445_s16, %s14_s16   ;;  %s412_s15 = sphi %s443_s15, %s485_s15   ;;  %s408_s14 = sphi %s441_s14, %s484_s14  }
   0x3   : > { %p28_p1 = scmp.ge.s32.totalorder %s26_s0, 2  ;;  %p163_p2 = scmp.lt.s32.totalorder %s416_s16, 3 }
   0x5   : > { %s487_s0 = smov (%p28_p1, %s26_s0), 0  ;;  %p164_p3 = pnand %p357_p0, %p163_p2 }
   0x6   : > { %p202_p4 = scmp.lt.s32.totalorder (!%p164_p3), %s408_s14, 1  ;;  %s221_s25 = sld [smem:[#allocation2]] (!%p164_p3) }
   0x7   : > { %167 = sbr.rel (%p164_p3) target bundleno = 149 (0x95), region = 32 }
   0xc   : > { %s489_s14 = smov (!%p202_p4, %s408_s14), 1  ;;  %v217_v2 = vld [vmem:[%s481_s1] sm:$0xff]  ;;  %vm223_vm0 = vcmask 130048   ;;  %v218_v3 = vld [vmem:[%s481_s1 + $0x8] sm:$0xff]  ;;  %v222_v4 = vstv %s221_s25  ;;  %vm253_vm1 = vcmask 31744  }
   0xd   : > { %s366_s17 = sshll.u32 %s489_s14, 4 }
   0xe   : > { %s206_s20 = scalar_lea.vmem %s482_s2, %s366_s17  ;;  %s215_s28 = scalar_lea.vmem %s483_s3, %s366_s17 }
   0xf   : > { %v220_v0 = vld [vmem:[%s206_s20 + $0x8] sm:$0xff]  ;;  %v219_v1 = vld [vmem:[%s206_s20] sm:$0xff] }
  0x10   : > { %244 = vmatpush.msra.mxu0 %v220_v0  ;;  %368 = vmatpush.msra.mxu1 %v220_v0 }
  0x12   : > { %245 = vmatpush.msra.mxu0 %v219_v1  ;;  %369 = vmatpush.msra.mxu1 %v219_v1 }
  0x13   : > { %362 = vmatmul.msk.f32.vlgmr.msra.gmra.mxu0 %vm223_vm0, %v217_v2  ;;  %363 = vmatmul.msk.f32.vlgmr.msra.gmra.mxu1 %vm223_vm0, %v218_v3 }
  0x90   : > { %v247_v5 = vpop.f32.mrf.mxu0  ;;  %v250_v6 = vpop.f32.mrf.mxu1 }
  0x91   : > { %v248_v7 = vadd.f32 %v247_v5, %v222_v4  ;;  %v251_v8 = vadd.f32 %v250_v6, %v222_v4 }
  0x93   : > { %254 = vst.msk [vmem:[%s215_s28] sm:$0xff] %vm253_vm1, %v248_v7 }
  0x94   : > { %255 = vst.msk [vmem:[%s215_s28 + $0x8] sm:$0xff] %vm253_vm1, %v251_v8 }
  0x95 PF: > { %s14_s16 = sadd.s32 1, %s416_s16   ;;  %s484_s14 = smov %s412_s15 }
  0x96   : > { %p11_p5 = scmp.ge.s32.totalorder %s14_s16, 4   ;;  %s485_s15 = smov %s487_s0 }
  0x98   :  { %13 = sbr.rel (!%p11_p5) target bundleno = 2 (0x2), region = 65 }

</bundles_post_ra>
